<compile_context>
chip_gen: v7x
topology: tpu7x:2x2x1
jax: 0.10.0
libtpu: 0.0.40
codegen_flags: <defaults>
</compile_context>

<pallas_src>
import functools

import jax
import jax.numpy as jnp
from jax.experimental import pallas as pl
from jax.experimental.pallas import tpu as pltpu

# gray conversion coefficients (same as the PyTorch module)
_GRAY_COEFFS = (65.738 / 256.0, 129.057 / 256.0, 25.064 / 256.0)


def _gradient_map_kernel(x_ref, halo_ref, o_ref, *, hs, use_roll):
    # x_ref:    (BT, 3, TH, W)  image tile, original dtype
    # halo_ref: (BT, 3, HS, W)  rows just above this tile (clamped to row 0)
    # o_ref:    (BT, 1, TH, W)
    c0, c1, c2 = _GRAY_COEFFS
    f32 = jnp.float32

    # grayscale of the tile (cast to f32 per channel; free under DMA slack)
    g = (x_ref[:, 0].astype(f32) * c0
         + x_ref[:, 1].astype(f32) * c1
         + x_ref[:, 2].astype(f32) * c2)                      # (BT, TH, W)

    # Gray of the global row directly above this tile.  For the first H tile
    # the "row above" is row 0 itself (replication padding); for later tiles it
    # is the last row of the halo block (global row i*TH - 1).
    h_row = jnp.where(pl.program_id(1) > 0,
                      halo_ref[:, :, hs - 1:hs, :],
                      halo_ref[:, :, 0:1, :]).astype(f32)     # (BT, 3, 1, W)
    g_prev = h_row[:, 0] * c0 + h_row[:, 1] * c1 + h_row[:, 2] * c2  # (BT,1,W)

    _, tile_rows, tile_cols = g.shape

    if use_roll:
        # Fast path (BT == 1, tile rows % 8 == 0, W % 128 == 0): XLU rotations
        # on the canonical aligned 2-D view + iota masks — no near-full-tile
        # VMEM copies from slicing/concatenation.
        g2 = g[0]                                             # (TH, W)
        rows = jax.lax.broadcasted_iota(jnp.int32, g2.shape, 0)
        cols = jax.lax.broadcasted_iota(jnp.int32, g2.shape, 1)
        g_up = jnp.where(rows == 0, g_prev[0], pltpu.roll(g2, 1, axis=0))[None]
        g_left = jnp.where(cols == 0, g2, pltpu.roll(g2, 1, axis=1))[None]
    else:
        # Fallback for unaligned tiles / folded batches (rotate needs (8,128)-
        # aligned shapes, which conflicts with unpadded W for small images).
        g_up = g_prev if tile_rows == 1 else jnp.concatenate(
            [g_prev, g[:, :-1, :]], axis=1)
        g_left = g if tile_cols == 1 else jnp.concatenate(
            [g[:, :, :1], g[:, :, :-1]], axis=2)

    i_x = (g - g_up) ** 2
    i_y = (g - g_left) ** 2
    o_ref[:, 0] = jnp.sqrt(i_x + i_y).astype(o_ref.dtype)


def gradient_map(x, *, tile_h=512, min_steps=4):
    """x: (N, 3, H, W) -> (N, 1, H, W) gradient-magnitude map."""
    n, c, h, w = x.shape
    assert c == 3, "Gradient_Map expects 3 input channels (RGB)"

    in_dtype = x.dtype
    # PyTorch returns float; keep float inputs' dtype, promote integer inputs.
    out_dtype = in_dtype if jnp.issubdtype(in_dtype, jnp.floating) else jnp.float32
    in_bytes = jnp.dtype(in_dtype).itemsize
    out_bytes = jnp.dtype(out_dtype).itemsize

    # ---- generation-aware VMEM budget (v7x: 64 MiB, v5e/v6e: 128 MiB) -------
    try:
        vmem_cap = int(getattr(pltpu.get_tpu_info(), "vmem_capacity_bytes",
                               64 << 20))
    except Exception:  # pragma: no cover - conservative fallback
        vmem_cap = 64 << 20
    vmem_cap = max(vmem_cap, 48 << 20)
    budget = (vmem_cap * 3) // 4            # ~48 MiB on v7x, ~96 MiB on v5e/v6e
    vmem_limit = int(max(32 << 20,
                         min(vmem_cap - (8 << 20), budget + (8 << 20))))

    # ---- tile sizing ---------------------------------------------------------
    # Per (batch element, image row): double-buffered in/out blocks + f32 temps.
    row_bytes = 2 * (3 * in_bytes + out_bytes) * w + 8 * 4 * w
    max_rows = max(8, budget // row_bytes)

    if h <= min(tile_h, max_rows):
        th = h                                          # single H tile (full extent)
    else:
        th = max(8, (min(tile_h, max_rows) // 8) * 8)   # multiple of 8; ragged tail OK

    bt_max = int(max(1, min(n, max_rows // max(th, 1))))
    bt = -(-n // (-(-n // bt_max)))                     # balanced batch tile size

    # Keep >= min_steps grid steps so both v7x TensorCores get work and the
    # double-buffered pipeline stays busy (split batch first, then H).
    while pl.cdiv(n, bt) * pl.cdiv(h, th) < min_steps and bt > 1:
        bt -= 1
    while pl.cdiv(n, bt) * pl.cdiv(h, th) < min_steps and th > 8:
        th_new = max(8, ((th // 2) // 8) * 8)
        if th_new == th:
            break
        th = th_new

    hs = 8 if h >= 8 else h                 # halo block rows (well-formed DMA)
    h_stride = max(1, th // hs)             # halo block index advance per H tile
    use_roll = (bt == 1) and (w % 128 == 0) and (th % 8 == 0)

    grid = (pl.cdiv(n, bt), pl.cdiv(h, th))

    kernel = functools.partial(_gradient_map_kernel, hs=hs, use_roll=use_roll)

    cost = pl.CostEstimate(
        flops=int(10 * n * h * w),                     # gray + diffs + squares + add
        transcendentals=int(n * h * w),                # sqrt
        bytes_accessed=int(n * h * w * (3 * in_bytes + out_bytes)),
    )

    return pl.pallas_call(
        kernel,
        out_shape=jax.ShapeDtypeStruct((n, 1, h, w), out_dtype),
        grid_spec=pltpu.PrefetchScalarGridSpec(
            num_scalar_prefetch=0,
            grid=grid,
            in_specs=[
                pl.BlockSpec((bt, 3, th, w), lambda b, i: (b, 0, i, 0)),
                # halo: hs rows ending exactly at this tile's first row
                # (clamped to block 0 -> replication-padding semantics)
                pl.BlockSpec(
                    (bt, 3, hs, w),
                    lambda b, i: (b, 0, jnp.maximum(i * h_stride - 1, 0), 0)),
            ],
            out_specs=pl.BlockSpec((bt, 1, th, w), lambda b, i: (b, 0, i, 0)),
        ),
        compiler_params=pltpu.CompilerParams(
            dimension_semantics=("parallel", "parallel"),
            vmem_limit_bytes=vmem_limit,
        ),
        cost_estimate=cost,
    )(x, x)


def _reference(x):
    """Pure-JAX reference mirroring the PyTorch forward exactly."""
    xp = jnp.pad(x, ((0, 0), (0, 0), (1, 0), (1, 0)), mode="edge")
    coeffs = jnp.array(_GRAY_COEFFS, dtype=jnp.float32).reshape(1, 3, 1, 1)
    g = (xp.astype(jnp.float32) * coeffs).sum(axis=1, keepdims=True)
    hh, ww = g.shape[2], g.shape[3]
    i_x = (g[:, :, 1:, 1:] - g[:, :, : hh - 1, 1:]) ** 2
    i_y = (g[:, :, 1:, 1:] - g[:, :, 1:, : ww - 1]) ** 2
    return jnp.sqrt(i_x + i_y)


if __name__ == "__main__":
    key = jax.random.PRNGKey(0)
    cases = [
        # (shape, kwargs) — exercise every code path:
        ((2, 3, 16, 16), {}),               # unaligned W -> concat path, min-step splitting
        ((2, 3, 32, 128), {"tile_h": 16}),  # (8,128)-aligned tiles -> pltpu.roll path + halo
        ((1, 3, 20, 24), {"tile_h": 8}),    # ragged last H tile -> masked writeback
    ]
    for shape, kwargs in cases:
        key, sub = jax.random.split(key)
        x = jax.random.uniform(sub, shape, dtype=jnp.float32)
        out = jax.block_until_ready(gradient_map(x, **kwargs))
        ref = _reference(x)
        assert out.shape == ref.shape, (out.shape, ref.shape)
        assert jnp.allclose(out, ref, atol=1e-5, rtol=1e-5), \
            f"mismatch for shape={shape} kwargs={kwargs}"
    print("KERNEL_OK")
</pallas_src>

<mosaic_0001>
module attributes {stable_mosaic.version = 11 : i64} {
  func.func @_gradient_map_kernel(%arg0: i32, %arg1: i32, %arg2: memref<1x3x8x16xf32, #tpu.memory_space<vmem>>, %arg3: memref<1x3x8x16xf32, #tpu.memory_space<vmem>>, %arg4: memref<1x1x8x16xf32, #tpu.memory_space<vmem>>) attributes {dimension_semantics = [#tpu.dimension_semantics<parallel>, #tpu.dimension_semantics<parallel>], iteration_bounds = array<i64: 2, 2>, scalar_prefetch = 0 : i64, scratch_operands = 0 : i64, tpu.core_type = #tpu.core_type<tc>, window_params = [{transform_indices = @transform_0, window_bounds = array<i64: 1, 3, 8, 16>}, {transform_indices = @transform_1, window_bounds = array<i64: 1, 3, 8, 16>}, {transform_indices = @transform_2, window_bounds = array<i64: 1, 1, 8, 16>}]} {
    %c0 = arith.constant 0 : index
    %c0_0 = arith.constant 0 : index
    %c0_1 = arith.constant 0 : index
    %c0_2 = arith.constant 0 : index
    %0 = vector.load %arg2[%c0, %c0_0, %c0_1, %c0_2] : memref<1x3x8x16xf32, #tpu.memory_space<vmem>>, vector<1x1x8x16xf32>
    %1 = vector.shape_cast %0 : vector<1x1x8x16xf32> to vector<1x8x16xf32>
    %cst = arith.constant 0.256789058 : f32
    %2 = vector.broadcast %cst : f32 to vector<1x8x16xf32>
    %3 = arith.mulf %1, %2 : vector<1x8x16xf32>
    %c0_3 = arith.constant 0 : index
    %c1 = arith.constant 1 : index
    %c0_4 = arith.constant 0 : index
    %c0_5 = arith.constant 0 : index
    %4 = vector.load %arg2[%c0_3, %c1, %c0_4, %c0_5] : memref<1x3x8x16xf32, #tpu.memory_space<vmem>>, vector<1x1x8x16xf32>
    %5 = vector.shape_cast %4 : vector<1x1x8x16xf32> to vector<1x8x16xf32>
    %cst_6 = arith.constant 0.504128933 : f32
    %6 = vector.broadcast %cst_6 : f32 to vector<1x8x16xf32>
    %7 = arith.mulf %5, %6 : vector<1x8x16xf32>
    %8 = arith.addf %3, %7 : vector<1x8x16xf32>
    %c0_7 = arith.constant 0 : index
    %c2 = arith.constant 2 : index
    %c0_8 = arith.constant 0 : index
    %c0_9 = arith.constant 0 : index
    %9 = vector.load %arg2[%c0_7, %c2, %c0_8, %c0_9] : memref<1x3x8x16xf32, #tpu.memory_space<vmem>>, vector<1x1x8x16xf32>
    %10 = vector.shape_cast %9 : vector<1x1x8x16xf32> to vector<1x8x16xf32>
    %cst_10 = arith.constant 0.0979062467 : f32
    %11 = vector.broadcast %cst_10 : f32 to vector<1x8x16xf32>
    %12 = arith.mulf %10, %11 : vector<1x8x16xf32>
    %13 = arith.addf %8, %12 : vector<1x8x16xf32>
    %c0_i32 = arith.constant 0 : i32
    %14 = arith.cmpi sgt, %arg1, %c0_i32 : i32
    %c0_11 = arith.constant 0 : index
    %c0_12 = arith.constant 0 : index
    %c7 = arith.constant 7 : index
    %c0_13 = arith.constant 0 : index
    %15 = vector.load %arg3[%c0_11, %c0_12, %c7, %c0_13] : memref<1x3x8x16xf32, #tpu.memory_space<vmem>>, vector<1x3x1x16xf32>
    %c0_14 = arith.constant 0 : index
    %c0_15 = arith.constant 0 : index
    %c0_16 = arith.constant 0 : index
    %c0_17 = arith.constant 0 : index
    %16 = vector.load %arg3[%c0_14, %c0_15, %c0_16, %c0_17] : memref<1x3x8x16xf32, #tpu.memory_space<vmem>>, vector<1x3x1x16xf32>
    %17 = arith.select %14, %15, %16 : vector<1x3x1x16xf32>
    %18 = vector.extract_strided_slice %17 {offsets = [0, 0, 0, 0], sizes = [1, 1, 1, 16], strides = [1, 1, 1, 1]} : vector<1x3x1x16xf32> to vector<1x1x1x16xf32>
    %19 = vector.shape_cast %18 : vector<1x1x1x16xf32> to vector<1x1x16xf32>
    %cst_18 = arith.constant 0.256789058 : f32
    %20 = vector.broadcast %cst_18 : f32 to vector<1x1x16xf32>
    %21 = arith.mulf %19, %20 : vector<1x1x16xf32>
    %22 = vector.extract_strided_slice %17 {offsets = [0, 1, 0, 0], sizes = [1, 1, 1, 16], strides = [1, 1, 1, 1]} : vector<1x3x1x16xf32> to vector<1x1x1x16xf32>
    %23 = vector.shape_cast %22 : vector<1x1x1x16xf32> to vector<1x1x16xf32>
    %cst_19 = arith.constant 0.504128933 : f32
    %24 = vector.broadcast %cst_19 : f32 to vector<1x1x16xf32>
    %25 = arith.mulf %23, %24 : vector<1x1x16xf32>
    %26 = arith.addf %21, %25 : vector<1x1x16xf32>
    %27 = vector.extract_strided_slice %17 {offsets = [0, 2, 0, 0], sizes = [1, 1, 1, 16], strides = [1, 1, 1, 1]} : vector<1x3x1x16xf32> to vector<1x1x1x16xf32>
    %28 = vector.shape_cast %27 : vector<1x1x1x16xf32> to vector<1x1x16xf32>
    %cst_20 = arith.constant 0.0979062467 : f32
    %29 = vector.broadcast %cst_20 : f32 to vector<1x1x16xf32>
    %30 = arith.mulf %28, %29 : vector<1x1x16xf32>
    %31 = arith.addf %26, %30 : vector<1x1x16xf32>
    %32 = vector.extract_strided_slice %13 {offsets = [0, 0, 0], sizes = [1, 7, 16], strides = [1, 1, 1]} : vector<1x8x16xf32> to vector<1x7x16xf32>
    %33 = tpu.concatenate %31, %32 in 1 : vector<1x1x16xf32>, vector<1x7x16xf32> -> vector<1x8x16xf32>
    %34 = vector.extract_strided_slice %13 {offsets = [0, 0, 0], sizes = [1, 8, 1], strides = [1, 1, 1]} : vector<1x8x16xf32> to vector<1x8x1xf32>
    %35 = vector.extract_strided_slice %13 {offsets = [0, 0, 0], sizes = [1, 8, 15], strides = [1, 1, 1]} : vector<1x8x16xf32> to vector<1x8x15xf32>
    %36 = tpu.concatenate %34, %35 in 2 : vector<1x8x1xf32>, vector<1x8x15xf32> -> vector<1x8x16xf32>
    %37 = arith.subf %13, %33 : vector<1x8x16xf32>
    %38 = arith.mulf %37, %37 : vector<1x8x16xf32>
    %39 = arith.subf %13, %36 : vector<1x8x16xf32>
    %40 = arith.mulf %39, %39 : vector<1x8x16xf32>
    %41 = arith.addf %38, %40 : vector<1x8x16xf32>
    %42 = math.sqrt %41 : vector<1x8x16xf32>
    %c0_21 = arith.constant 0 : index
    %c0_22 = arith.constant 0 : index
    %c0_23 = arith.constant 0 : index
    %c0_24 = arith.constant 0 : index
    %43 = vector.load %arg4[%c0_21, %c0_22, %c0_23, %c0_24] : memref<1x1x8x16xf32, #tpu.memory_space<vmem>>, vector<1x1x8x16xf32>
    %44 = vector.shape_cast %43 : vector<1x1x8x16xf32> to vector<1x8x16xf32>
    %45 = vector.shape_cast %42 : vector<1x8x16xf32> to vector<1x1x8x16xf32>
    tpu.vector_store %arg4[%c0_21, %c0_22, %c0_23, %c0_24], %45 {strides = array<i32>} : memref<1x1x8x16xf32, #tpu.memory_space<vmem>>, vector<1x1x8x16xf32>,
    return
  }
  func.func @transform_0(%arg0: i32, %arg1: i32) -> (i32, i32, i32, i32) {
    %c0_i32 = arith.constant 0 : i32
    %c0_i32_0 = arith.constant 0 : i32
    %c0_i32_1 = arith.constant 0 : i32
    return %arg0, %c0_i32, %arg1, %c0_i32_0 : i32, i32, i32, i32
  }
  func.func @transform_1(%arg0: i32, %arg1: i32) -> (i32, i32, i32, i32) {
    %c1_i32 = arith.constant 1 : i32
    %0 = arith.muli %arg1, %c1_i32 : i32
    %c1_i32_0 = arith.constant 1 : i32
    %1 = arith.subi %0, %c1_i32_0 : i32
    %c0_i32 = arith.constant 0 : i32
    %2 = arith.maxsi %1, %c0_i32 : i32
    %c0_i32_1 = arith.constant 0 : i32
    %c0_i32_2 = arith.constant 0 : i32
    %c0_i32_3 = arith.constant 0 : i32
    return %arg0, %c0_i32_1, %2, %c0_i32_2 : i32, i32, i32, i32
  }
  func.func @transform_2(%arg0: i32, %arg1: i32) -> (i32, i32, i32, i32) {
    %c0_i32 = arith.constant 0 : i32
    %c0_i32_0 = arith.constant 0 : i32
    %c0_i32_1 = arith.constant 0 : i32
    return %arg0, %c0_i32, %arg1, %c0_i32_0 : i32, i32, i32, i32
  }
}

</mosaic_0001>

<bundles_post_ra>
// kernel: tpu_custom_call.1
= control target key start
LH: loop header
LB: loop body
LE: loop exit
PB: predicated region body
PF: predicated region fallthrough
CT: control target
= control target key end

     0   :  { %s1075_s0 = inlined_call_operand.hbm [shape: f32[2,3,16,16], index: 0, kind: input, shape index: {}]   ;;  %s1076_s1 = inlined_call_operand.hbm [shape: f32[2,3,16,16], index: 1, kind: input, shape index: {}]   ;;  %s1077_s2 = inlined_call_operand.hbm [shape: f32[2,1,16,16], index: 2, kind: output, shape index: {}]  }
   0x1   :  { %1089 = sst [smem:[#allocation12_spill]] %s1075_s0 }
   0x2   :  { %7 = vsyncpa [#allocation3], 0 }
   0x3   :  { %9 = vsyncpa [#allocation3 + $0x1], 0 }
   0x4   :  { %10 = vsyncpa [#allocation6], 0 }
   0x5   :  { %12 = vsyncpa [#allocation6 + $0x1], 0 }
   0x6   :  { %13 = vsyncpa [#allocation4], 0 }
   0x7   :  { %15 = vsyncpa [#allocation4 + $0x1], 0  ;;  %s760_s9 = smov 0   ;;  %s762_s10 = smov 0  }
   0x8   :  { %s764_s11 = smov 0   ;;  %s766_s12 = smov 0  }
   0x9   :  { %s768_s13 = smov 0   ;;  %s770_s14 = smov 0  }
   0xa   :  { %s772_s15 = smov 0   ;;  %s774_s16 = smov 0  }
   0xb   :  { %s776_s17 = smov 0   ;;  %s778_s18 = smov 0  }
   0xc   :  { %s780_s19 = smov 0  }
   0xd LB: > { %s412_s20 = sadd.s32 4294967295, %s736_s19   ;;  %s413_s21 = sadd.s32 4294967294, %s736_s19   ;;  %s736_s19 = sphi %s780_s19, %s21_s19   ;;  %s732_s18 = sphi %s778_s18, %s1124_s18   ;;  %s728_s17 = sphi %s776_s17, %s1123_s17   ;;  %s724_s16 = sphi %s774_s16, %s1122_s16   ;;  %s720_s15 = sphi %s772_s15, %s1121_s15   ;;  %s716_s14 = sphi %s770_s14, %s1120_s14   ;;  %s712_s13 = sphi %s768_s13, %s1119_s13   ;;  %s708_s12 = sphi %s766_s12, %s1118_s12   ;;  %s704_s11 = sphi %s764_s11, %s1117_s11   ;;  %s700_s10 = sphi %s762_s10, %s1116_s10   ;;  %s696_s9 = sphi %s760_s9, %s1115_s9  }
   0xe   : > { %s1078_s22 = sadd.s32 1, %s728_s17  ;;  %p49_p1 = scmp.ne.s32.totalorder %s716_s14, %s712_s13 }
   0xf   : > { %p820_p0 = scmp.ge.s32.totalorder %s1078_s22, 2  ;;  %p1080_p2 = scmp.eq.s32.totalorder %s736_s19, 0 }
  0x10   : > { %p55_p3 = scmp.ne.s32.totalorder %s712_s13, %s708_s12  ;;  %p830_p4 = scmp.eq.s32.totalorder %s412_s20, 0 }
  0x11   : > { %p51_p5 = por %p1080_p2, %p49_p1  ;;  %p115_p6 = scmp.eq.s32.totalorder %s412_s20, 3 }
  0x12   : > { %s1091_s25 = scalar_select %p830_p4, 1, 0 }
  0x13   : > { %p838_p7 = por %p830_p4, %p55_p3  ;;  %p121_p8 = scmp.eq.s32.totalorder %s413_s21, 3 }
  0x14   : > { %p842_p9 = por %p115_p6, %p49_p1  ;;  %p1079_p11 = scmp.lt.s32.totalorder %s736_s19, 4 }
  0x15   : > { %s1092_s26 = scalar_select %p838_p7, 1, 0 }
  0x16   : > { %s1093_s27 = scalar_select %p842_p9, 1, 0 }
  0x17   : > { %p846_p10 = por %p121_p8, %p55_p3  ;;  %s141_s29 = sand.u32 1, %s716_s14  }
  0x18   : > { %s431_s30 = smul.u32 6, %s732_s18  ;;  %p856_p12 = pnand %p1079_p11, %p51_p5 }
  0x19   : > { %s1094_s28 = scalar_select %p846_p10, 1, 0 }
  0x1a   : > { %s430_s3 = smul.u32 24, %s141_s29  ;;  %s150_s4 = sadd.s32 %s728_s17, %s431_s30 }
  0x1b   : > { %s418_s6 = sshll.u32 %s150_s4, 7  ;;  %s1096_s0 = sld [smem:[#allocation12_spill]] }
  0x1c   : > { %s145_s21 = scalar_lea.vmem [#allocation2], %s430_s3  ;;  %s868_s30 = scalar_lea.sflag [#allocation3], %s141_s29 }
  0x1d   : > { %s153_s24 = sshll.u32 %s145_s21, 4  ;;  %p551_p3 = pneg %p856_p12  ;;  %s865_s24 = int_to_ptr.vmem [resolvable:$true] %s153_s24 }
  0x21   : > { %s863_s20 = scalar_lea.hbm %s1096_s0, %s418_s6  ;;  %s554_s7 = scalar_lea.hbm %s1096_s0, 1536 }
  0x22   : > { %s549_s22 = scalar_lea.hbm %s863_s20, 384  ;;  %p555_p8 = scmp.lt.u32.totalorder %s863_s20, %s1096_s0 }
  0x23   : > { %p550_p1 = scmp.ne.s32.totalorder %s863_s20, %s549_s22  ;;  %p556_p11 = scmp.lt.u32.totalorder %s554_s7, %s549_s22 }
  0x24   : > { %p558_p13 = scmp.lt.u32.totalorder %s549_s22, %s863_s20 }
  0x25   : > { %p552_p5 = pnand %p551_p3, %p550_p1  ;;  %p557_p2 = por %p556_p11, %p555_p8 }
  0x27   : > { %p553_p6 = pneg %p552_p5  ;;  %p559_p10 = por %p558_p13, %p557_p2 }
  0x29   : > { %p560_p9 = pnand %p559_p10, %p553_p6 }
  0x2b   : > { %563 = shalt.err (!%p560_p9)
}
  0x2c   : > { %s564_s29 = scalar_lea.vmem %s865_s24, 384  ;;  %s738_s21 = smov [#allocation2]  }
  0x2d   : > { %p565_p1 = scmp.ne.s32.totalorder %s865_s24, %s564_s29  ;;  %s569_s4 = sshll.u32 %s738_s21, 4  ;;  %s570_s4 = int_to_ptr.vmem [resolvable:$false] %s569_s4 }
  0x2e   : > { %s571_s6 = scalar_lea.vmem %s570_s4, 768  ;;  %p572_p4 = scmp.lt.s32.totalorder %s865_s24, %s570_s4 }
  0x2f   : > { %p567_p5 = pnand %p565_p1, %p551_p3  ;;  %p573_p11 = scmp.lt.s32.totalorder %s571_s6, %s564_s29 }
  0x31   : > { %p568_p7 = pneg %p567_p5  ;;  %p574_p8 = por %p573_p11, %p572_p4 }
  0x33   : > { %p575_p2 = pnand %p574_p8, %p568_p7 }
  0x35   : > { %578 = shalt.err (!%p575_p2)
}
  0x36   : > { %s1084_s22 = smov 256   ;;  %s1085_s7 = smov 128  }
  0x37   : > { %s1086_s8 = smov 8   ;;  %s42_s3 = sadd.s32 1, %s716_s14 }
  0x38   : > { %445 = dma.hbm_to_vmem [thread:$0]  (!%p856_p12), %s863_s20, 384, %s865_s24, %s868_s30, %s1084_s22, %s1085_s7, %s1086_s8  }
  0x39   : > { %p186_p4 = scmp.lt.s32.totalorder %s736_s19, 5  ;;  %p1097_p7 = scmp.ge.s32.totalorder %s736_s19, 1 }
  0x3a   : > { %s1099_s21 = sadd.s32 1, %s728_s17  ;;  %s1100_s5 = sadd.s32 1, %s732_s18 }
  0x3b   : > { %p903_p9 = pnand %p1097_p7, %p186_p4  ;;  %s1126_s21 = smov (%p820_p0, %s1099_s21), 0 }
  0x3c   : > { %s1128_s5 = smov (!%p820_p0, %s1100_s5), %s732_s18  ;;  %s38_s24 = ssub.s32 %s728_s17, %s1126_s21 }
  0x3d   : > { %p35_p10 = scmp.ge.s32.totalorder %s1128_s5, 2  ;;  %p83_p12 = scmp.ne.s32.totalorder %s704_s11, %s700_s10 }
  0x3e   : > { %p89_p3 = scmp.ne.s32.totalorder %s700_s10, %s696_s9  ;;  %s76_s6 = sadd.s32 1, %s704_s11 }
  0x3f   : > { %s1130_s5 = smov (%p35_p10, %s1128_s5), 0  ;;  %p1102_p6 = scmp.ne.s32.totalorder %s1091_s25, 0 }
  0x40   : > { %1101 = sst [smem:[#allocation11_spill]] %s1130_s5  ;;  %s37_s20 = ssub.s32 %s732_s18, %s1130_s5 }
  0x41   : > { %s39_s30 = sor.u32 %s38_s24, %s37_s20  ;;  %p934_p1 = por %p89_p3, %p1102_p6 }
  0x42   : > { %p40_p13 = scmp.eq.s32.totalorder %s39_s30, 0  ;;  %p74_p0 = scmp.eq.s32.totalorder %s37_s20, 0 }
  0x43   : > { %s1103_s23 = scalar_select %p934_p1, 1, 0 }
  0x44   : > { %s929_s4 = scalar_select %p40_p13, %s716_s14, %s42_s3  }
  0x45   : > { %s163_s22 = sand.u32 1, %s704_s11   ;;  %p1104_p5 = scmp.eq.s32.totalorder %s736_s19, 0 }
  0x46   : > { %s432_s7 = smul.u32 24, %s163_s22  ;;  %p1105_p8 = scmp.lt.s32.totalorder %s736_s19, 4 }
  0x47   : > { %p85_p11 = por %p83_p12, %p1104_p5  ;;  %s693_s24 = smul.u32 768, %s732_s18 }
  0x48   : > { %s942_s8 = scalar_select %p74_p0, %s704_s11, %s76_s6  }
  0x49   : > { %s167_s0 = scalar_lea.vmem [#allocation5], %s432_s7  ;;  %s948_s3 = scalar_lea.hbm %s1076_s1, %s693_s24 }
  0x4a   : > { %s178_s5 = sshll.u32 %s167_s0, 4  ;;  %p954_p2 = pnand %p1105_p8, %p85_p11  ;;  %s950_s5 = int_to_ptr.vmem [resolvable:$true] %s178_s5 }
  0x4b   : > { %s958_s7 = scalar_lea.sflag [#allocation6], %s163_s22  ;;  %s579_s0 = scalar_lea.hbm %s948_s3, 384 }
  0x4c   : > { %p580_p4 = scmp.ne.s32.totalorder %s948_s3, %s579_s0  ;;  %p581_p7 = pneg %p954_p2 }
  0x4d   : > { %s584_s24 = scalar_lea.hbm %s1076_s1, 1536  ;;  %p585_p13 = scmp.lt.u32.totalorder %s948_s3, %s1076_s1 }
  0x4e   : > { %p582_p10 = pnand %p581_p7, %p580_p4  ;;  %p586_p3 = scmp.lt.u32.totalorder %s584_s24, %s579_s0 }
  0x4f   : > { %p588_p0 = scmp.lt.u32.totalorder %s579_s0, %s948_s3 }
  0x50   : > { %p583_p12 = pneg %p582_p10  ;;  %p587_p6 = por %p586_p3, %p585_p13 }
  0x52   : > { %p589_p5 = por %p588_p0, %p587_p6 }
  0x54   : > { %p590_p11 = pnand %p589_p5, %p583_p12 }
  0x56   : > { %593 = shalt.err (!%p590_p11)
}
  0x57   : > { %s594_s22 = scalar_lea.vmem %s950_s5, 384  ;;  %s742_s20 = smov [#allocation5]  }
  0x58   : > { %p595_p8 = scmp.ne.s32.totalorder %s950_s5, %s594_s22  ;;  %s599_s6 = sshll.u32 %s742_s20, 4  ;;  %s600_s6 = int_to_ptr.vmem [resolvable:$false] %s599_s6 }
  0x59   : > { %s601_s30 = scalar_lea.vmem %s600_s6, 768  ;;  %p602_p1 = scmp.lt.s32.totalorder %s950_s5, %s600_s6 }
  0x5a   : > { %p597_p4 = pnand %p595_p8, %p581_p7  ;;  %p603_p13 = scmp.lt.s32.totalorder %s601_s30, %s594_s22 }
  0x5c   : > { %p598_p10 = pneg %p597_p4  ;;  %p604_p3 = por %p603_p13, %p602_p1 }
  0x5e   : > { %p605_p6 = pnand %p604_p3, %p598_p10 }
  0x60   : > { %608 = shalt.err (!%p605_p6)
}
  0x61   : > { %s1107_s0 = smov 8   ;;  %s1108_s24 = smov 128  }
  0x62   : > { %s1109_s9 = smov 256   ;;  %190 = sbr.rel (%p903_p9) target bundleno = 269 (0x10d), region = 28 }
  0x63   : > { %448 = dma.hbm_to_vmem [thread:$0]  (!%p954_p2), %s948_s3, 384, %s950_s5, %s958_s7, %s1109_s9, %s1108_s24, %s1107_s0  }
  0x64   : > { %s992_s20 = sand.u32 (!%p903_p9), 1, %s712_s13   ;;  %p1110_p1 = scmp.ne.s32.totalorder (!%p903_p9), %s1092_s26, 0 }
  0x65   : > { %s434_s22 = smul.u32 (!%p903_p9), 24, %s992_s20  ;;  %s193_s6 = scalar_lea.sflag (!%p903_p9), [#allocation3], %s992_s20 }
  0x67   : > { %s196_s30 = scalar_lea.vmem (!%p903_p9), [#allocation2], %s434_s22 }
  0x69   : > { %682 = dma.done.wait (%p1110_p1), %s193_s6, 384  }
  0x6a   : > { %684 = vsyncadd (%p1110_p1), %s193_s6, 4294966912  ;;  %s201_s5 = sand.u32 1, %s700_s10   ;;  %p1111_p9 = scmp.ne.s32.totalorder %s1103_s23, 0 }
  0x6b   : > { %s435_s3 = smul.u32 24, %s201_s5  ;;  %s202_s29 = scalar_lea.sflag [#allocation6], %s201_s5 }
  0x6d   : > { %s205_s25 = scalar_lea.vmem [#allocation5], %s435_s3 }
  0x6e   : > { %686 = dma.done.wait (%p1111_p9), %s202_s29, 384  }
  0x6f   : > { %688 = vsyncadd (%p1111_p9), %s202_s29, 4294966912  ;;  %v234_v0 = vld [vmem:[%s196_s30] sm:$0xff]  ;;  %v423_v1 = vld [vmem:[%s196_s30 + $0x8] sm:$0xff]  ;;  %s743_s26 = smov 1   ;;  %p244_p2 = scmp.gt.s32.totalorder %s720_s15, 0  ;;  %vm265_vm1 = vcmask 1040384  }
  0x70   : > { %v424_v2 = vld [vmem:[%s196_s30 + $0x10] sm:$0xff]  ;;  %v235_v3 = vmul.f32 0.25678906, %v234_v0  ;;  %v238_v4 = vmul.f32 0.50412893, %v423_v1  ;;  %vm270_vm2 = vcmask 7168  }
  0x71   : > { %v242_v5 = vmul.f32 0.09790625, %v424_v2  ;;  %s251_s7 = scalar_select %p244_p2, 1, 0  ;;  %v245_v9 = vld [vmem:[%s205_s25 + $0x7] sm:$0x1] }
  0x72   : > { %v239_v6 = vadd.f32 %v238_v4, %v235_v3  ;;  %v246_v10 = vld [vmem:[%s205_s25 + $0xf] sm:$0x1]  ;;  %v248_v11 = vld [vmem:[%s205_s25] sm:$0x1]  ;;  %v249_v12 = vld [vmem:[%s205_s25 + $0x8] sm:$0x1] }
  0x73   : > { %v252_v8 = vstv %s251_s7  ;;  %v247_v15 = vld [vmem:[%s205_s25 + $0x17] sm:$0x1]  ;;  %v250_v16 = vld [vmem:[%s205_s25 + $0x10] sm:$0x1]  ;;  %s422_s23 = sshll.u32 %s992_s20, 3  ;;  %s426_s0 = sshll.u32 %s724_s16, 1 }
  0x74   : > { %v243_v7 = vadd.f32 %v242_v5, %v239_v6  ;;  %vm253_vm0 = vcmp.eq.s32.totalorder %v252_v8, 1  ;;  %s298_s24 = sadd.s32 %s720_s15, %s426_s0  ;;  %s230_s22 = scalar_lea.vmem [#allocation7], %s422_s23  ;;  %vm284_vm4 = vcmask 130048  }
  0x75   : > { %v254_v13 = vsel %vm253_vm0, %v245_v9, %v248_v11  ;;  %v255_v14 = vsel %vm253_vm0, %v246_v10, %v249_v12  ;;  %v256_v19 = vsel %vm253_vm0, %v247_v15, %v250_v16  ;;  %s427_s9 = sshll.u32 %s298_s24, 7  ;;  %s302_s6 = sshll.u32 %s230_s22, 4  ;;  %s1014_s6 = int_to_ptr.vmem [resolvable:$true] %s302_s6 }
  0x76   : > { %267 = vrot.lane.b32.xlu0 %v243_v7, %s743_s26  ;;  %v257_v17 = vmul.f32 0.25678906, %v254_v13  ;;  %v258_v18 = vmul.f32 0.50412893, %v255_v14  ;;  %v260_v21 = vmul.f32 0.09790625, %v256_v19  ;;  %s1012_s3 = scalar_lea.hbm %s1077_s2, %s427_s9 }
  0x77   : > { %v263_v23 = vrot.slane %v243_v7, 7  ;;  %s287_s15 = scalar_lea.sflag [#allocation4], %s992_s20  ;;  %s609_s16 = scalar_lea.vmem %s1014_s6, 128 }
  0x78   : > { %v259_v20 = vadd.f32 %v258_v18, %v257_v17  ;;  %p610_p7 = scmp.ne.s32.totalorder %s1014_s6, %s609_s16  ;;  %p1112_p12 = scmp.ne.s32.totalorder %s1093_s27, 0 }
  0x79   : > { %s744_s29 = smov [#allocation7]  }
  0x7a   : > { %v261_v22 = vadd.f32 %v260_v21, %v259_v20  ;;  %p611_p0 = pnand %p610_p7, %p1112_p12  ;;  %s613_s25 = sshll.u32 %s744_s29, 4  ;;  %s614_s25 = int_to_ptr.vmem [resolvable:$false] %s613_s25 }
  0x7b   : > { %s615_s26 = scalar_lea.vmem %s614_s25, 256  ;;  %p616_p11 = scmp.lt.s32.totalorder %s1014_s6, %s614_s25 }
  0x7c   : > { %v266_v24 = vsel %vm265_vm1, %v261_v22, %v263_v23  ;;  %p612_p5 = pneg %p611_p0  ;;  %p617_p8 = scmp.lt.s32.totalorder %s615_s26, %s609_s16 }
  0x7d   : > { %v272_v25 = vsub.f32 %v243_v7, %v266_v24 }
  0x7e   : > { %p618_p4 = por %p617_p8, %p616_p11 }
  0x7f   : > { %v273_v28 = vmul.f32 %v272_v25, %v272_v25 }
  0x80   : > { %p619_p10 = pnand %p618_p4, %p612_p5 }
  0xe8   : > { %v268_v26 = vpop.permute.xlu0 %267 }
  0xe9   : > { %v271_v27 = vsel %vm270_vm2, %v243_v7, %v268_v26 }
  0xea   : > { %v274_v29 = vsub.f32 %v243_v7, %v271_v27 }
  0xec   : > { %v275_v30 = vmul.f32 %v274_v29, %v274_v29 }
  0xee   : > { %v276_v31 = vadd.f32 %v275_v30, %v273_v28 }
  0xf0   : > { %547 = vrsqrt.f32 %v276_v31  ;;  %vm279_vm3 = vcmp.eq.f32.partialorder %v276_v31, inf  ;;  %v282_v34 = vand.u32 2147483648, %v276_v31  ;;  %vm281_vm5 = vcmp.eq.f32.partialorder %v276_v31, 0.0 }
  0xfa   : > { %v548_v32 = vpop.eup %547 }
  0xfb   : > { %v278_v33 = vmul.f32 %v548_v32, %v276_v31 }
  0xfd   : > { %v280_v35 = vsel %vm279_vm3, %v276_v31, %v278_v33 }
  0xfe   : > { %v283_v36 = vsel %vm281_vm5, %v282_v34, %v280_v35 }
  0xff   : > { %285 = vst.msk [vmem:[%s230_s22] sm:$0xff] %vm284_vm4, %v283_v36 }
 0x100   : > { %622 = shalt.err (!%p619_p10)
}
 0x101   : > { %s623_s20 = scalar_lea.hbm %s1012_s3, 128  ;;  %s627_s0 = scalar_lea.hbm %s1077_s2, 512 }
 0x102   : > { %p624_p13 = scmp.ne.s32.totalorder %s1012_s3, %s623_s20  ;;  %p628_p1 = scmp.lt.u32.totalorder %s1012_s3, %s1077_s2 }
 0x103   : > { %p629_p9 = scmp.lt.u32.totalorder %s627_s0, %s623_s20  ;;  %p631_p7 = scmp.lt.u32.totalorder %s623_s20, %s1012_s3 }
 0x104   : > { %p625_p3 = pnand %p624_p13, %p1112_p12 }
 0x105   : > { %p630_p2 = por %p629_p9, %p628_p1 }
 0x106   : > { %p626_p6 = pneg %p625_p3 }
 0x107   : > { %p632_p0 = por %p631_p7, %p630_p2 }
 0x109   : > { %p633_p5 = pnand %p632_p0, %p626_p6 }
 0x10b   : > { %636 = shalt.err (!%p633_p5)
}
 0x10c   : > { %440 = dma.vmem_to_hbm [thread:$0]  (%p1112_p12), %s1014_s6, 128, %s1012_s3, %s287_s15  }
 0x10d PF: > { %p454_p11 = scmp.ge.s32.totalorder %s736_s19, 2  ;;  %s314_s22 = sand.u32 1, %s708_s12  }
 0x10e   : > { %p1113_p8 = scmp.ne.s32.totalorder %s1094_s28, 0  ;;  %s315_s30 = scalar_lea.sflag [#allocation4], %s314_s22 }
 0x110   : > { %p450_p4 = pnand %p454_p11, %p1113_p8 }
 0x112   : > { %690 = dma.done.wait (!%p450_p4), %s315_s30, 128  }
 0x113   : > { %692 = vsyncadd (!%p450_p4), %s315_s30, 4294967168  ;;  %s21_s19 = sadd.s32 1, %s736_s19   ;;  %s1114_s27 = sld [smem:[#allocation11_spill]] }
 0x114   : > { %p18_p10 = scmp.ge.s32.totalorder %s21_s19, 6   ;;  %s1115_s9 = smov %s700_s10 }
 0x115   : > { %s1116_s10 = smov %s704_s11  ;;  %s1117_s11 = smov %s942_s8 }
 0x116   : > { %s1118_s12 = smov %s712_s13  ;;  %s1119_s13 = smov %s716_s14 }
 0x117   : > { %s1120_s14 = smov %s929_s4  ;;  %s1121_s15 = smov %s728_s17 }
 0x118   : > { %s1122_s16 = smov %s732_s18  ;;  %s1123_s17 = smov %s1126_s21 }
 0x119   : > { %s1124_s18 = smov %s1114_s27  ;;  %20 = sbr.rel (!%p18_p10) target bundleno = 13 (0xd), region = 88 }
 0x120   :  { %320 = vsyncpa [#allocation3], 1 }
 0x121   :  { %322 = vsyncpa [#allocation3 + $0x1], 1 }
 0x122   :  { %323 = vsyncpa [#allocation6], 1 }
 0x123   :  { %325 = vsyncpa [#allocation6 + $0x1], 1 }
 0x124   :  { %326 = vsyncpa [#allocation4], 1 }
 0x125   :  { %328 = vsyncpa [#allocation4 + $0x1], 1 }

</bundles_post_ra>
